<compile_context>
chip_gen: v5e
topology: v5e:2x2
jax: 0.10.0
libtpu: 0.0.40
codegen_flags: <defaults>
</compile_context>

<pallas_src>
import jax
import jax.numpy as jnp
from jax.experimental import pallas as pl
from jax.experimental.pallas import tpu as pltpu


def deepset_kernel(x_ref, w1_ref, b1_ref, w2_ref, b2_ref,
                   w3_ref, b3_ref, w4_ref, b4_ref, w5_ref, b5_ref, o_ref):
    # x: [1, S*TB] — element-major: column j*TB + s holds element j of set s.
    x = x_ref[...]
    wd = w2_ref.dtype                      # matmul input dtype (bf16 or f32)
    TB = o_ref.shape[1]
    S = x_ref.shape[1] // TB

    # ---- embedder: Linear(1, H) -> ReLU (outer-product broadcast, pure VPU) ----
    h = jnp.maximum(w1_ref[...] * x + b1_ref[...], 0.0)              # [H, S*TB] f32

    # ---- embedder: Linear(H, H) -> ReLU (MXU, f32 accumulate) ----
    h = jnp.maximum(
        jnp.dot(w2_ref[...], h.astype(wd), preferred_element_type=jnp.float32)
        + b2_ref[...], 0.0)                                           # [H, S*TB]

    # ---- per-set mean over S elements: S-1 lane-aligned VPU adds + scale ----
    # (static slices at multiples of TB, TB % 128 == 0 -> no relayout, no MXU)
    m = h[:, 0:TB]
    for j in range(1, S):
        m = m + h[:, j * TB:(j + 1) * TB]
    m = m * (1.0 / S)                                                 # [H, TB]

    # ---- combiner: Linear(H,H)->ReLU -> Linear(H,H)->ReLU ----
    c = jnp.maximum(
        jnp.dot(w3_ref[...], m.astype(wd), preferred_element_type=jnp.float32)
        + b3_ref[...], 0.0)                                           # [H, TB]
    c = jnp.maximum(
        jnp.dot(w4_ref[...], c.astype(wd), preferred_element_type=jnp.float32)
        + b4_ref[...], 0.0)                                           # [H, TB]

    # ---- final Linear(H, 1): VPU multiply + sublane reduce, lane-dense output ----
    out = jnp.sum(c * w5_ref[...], axis=0, keepdims=True) + b5_ref[...]  # [1, TB]
    o_ref[...] = out.astype(o_ref.dtype)


def _round_up(n, m):
    return (n + m - 1) // m * m


def _choose_batch_tile(B, S):
    """Batch tile (sets per grid step): multiple of 128, never below 128."""
    if B <= 128:
        return 128
    # Target a few thousand set-element columns per step so the ~0.35 us
    # per-step overhead is amortized, but prefer >= 2 grid steps so v7x's two
    # TensorCores both get work via the "parallel" batch axis.
    target_cols = 4096
    tb = max(128, (target_cols // max(S, 1)) // 128 * 128)
    half = (_round_up(B, 128) // 2) // 128 * 128
    if half >= 128:
        tb = min(tb, half)
    return tb


def deepset_forward(x, params, *, batch_tile=None, matmul_dtype=jnp.bfloat16):
    """x: float32 [batch, n_support, 1] -> float32 [batch].

    matmul_dtype=jnp.bfloat16 (default) casts the H x H matmul inputs to bf16
    with f32 accumulation — the MXU is natively bf16 on v5e/v6e/v7x, so this
    is the right default everywhere.  All elementwise math stays f32.
    Pass matmul_dtype=jnp.float32 for bit-accurate-to-reference results.
    """
    B, S, D = x.shape
    assert D == 1
    H = params["w2"].shape[0]

    TB = batch_tile if batch_tile is not None else _choose_batch_tile(B, S)
    TB = max(128, _round_up(TB, 128))           # lane-dense, never below 128
    B_pad = _round_up(B, TB)
    G = B_pad // TB
    R = TB * S                                  # lane columns per block

    # x: [B, S, 1] -> element-major lane row [1, B_pad*S]:
    #   within block i, column j*TB + s = element j of set (i*TB + s).
    # Padded sets are zeros; their (finite) outputs are sliced off below.
    x2 = x.reshape(B, S)
    if B_pad != B:
        x2 = jnp.pad(x2, ((0, B_pad - B), (0, 0)))
    x_row = x2.reshape(G, TB, S).transpose(0, 2, 1).reshape(1, B_pad * S)

    col = lambda v: v.reshape(-1, 1)
    wd = matmul_dtype
    w1 = params["w1"]                           # [H, 1] (PyTorch [out, in])
    b1 = col(params["b1"])                      # [H, 1]
    w2 = params["w2"].astype(wd); b2 = col(params["b2"])
    w3 = params["w3"].astype(wd); b3 = col(params["b3"])
    w4 = params["w4"].astype(wd); b4 = col(params["b4"])
    w5 = params["w5"].reshape(H, 1)             # [H, 1] column for the VPU reduce
    b5 = params["b5"].reshape(1, 1)

    def resident(a):  # whole array, constant index map -> stays in VMEM
        return pl.BlockSpec(a.shape, lambda i: (0, 0))

    grid_spec = pltpu.PrefetchScalarGridSpec(
        num_scalar_prefetch=0,
        grid=(G,),
        in_specs=[pl.BlockSpec((1, R), lambda i: (0, i))]
                 + [resident(a) for a in
                    (w1, b1, w2, b2, w3, b3, w4, b4, w5, b5)],
        out_specs=pl.BlockSpec((1, TB), lambda i: (0, i)),
    )
    # TODO(synk): if profiling shows the x DMA exposed at large G, add
    # pipeline_mode=pl.Buffered(3) to the x BlockSpec only.

    # Per-step VMEM estimate (double-buffered x / out, f32 intermediates,
    # one matmul-dtype cast copy, weights) + ~25% headroom, capped for v7x.
    wd_bytes = jnp.dtype(wd).itemsize
    vmem_est = (2 * 4 * R                       # x (double-buffered)
                + 2 * 4 * H * R                 # h (two f32 intermediates)
                + wd_bytes * H * R              # cast copy fed to the MXU
                + 8 * 4 * H * TB                # m, c, temporaries
                + 2 * 4 * TB                    # output (double-buffered)
                + 8 * (3 * H * H + 6 * H + 2)   # weights / biases
                + (1 << 20))                    # fixed slack
    vmem_limit = int(min(max(vmem_est * 1.25, 8 << 20), 64 << 20))

    flops = (2 * B_pad * S * H                  # embedder layer 1 (scale+bias)
             + 2 * B_pad * S * H * H            # embedder layer 2 (MXU)
             + B_pad * S * H                    # mean pooling (VPU adds)
             + 2 * 2 * B_pad * H * H            # combiner layers 1-2
             + 2 * B_pad * H)                   # final dot-product layer
    bytes_accessed = (4 * B_pad * S                          # x
                      + wd_bytes * 3 * H * H + 4 * (6 * H + 2)  # weights/biases
                      + 4 * B_pad)                            # output

    out = pl.pallas_call(
        deepset_kernel,
        out_shape=jax.ShapeDtypeStruct((1, B_pad), jnp.float32),
        grid_spec=grid_spec,
        compiler_params=pltpu.CompilerParams(
            dimension_semantics=("parallel",),
            vmem_limit_bytes=vmem_limit),
        cost_estimate=pl.CostEstimate(
            flops=flops, transcendentals=0, bytes_accessed=bytes_accessed),
    )(x_row, w1, b1, w2, b2, w3, b3, w4, b4, w5, b5)

    return out.reshape(-1)[:B]


def init_params(key, hidden):
    """PyTorch-style nn.Linear init; weights kept in PyTorch [out, in] layout."""
    def linear(k, fan_in, fan_out):
        kw, kb = jax.random.split(k)
        bound = 1.0 / jnp.sqrt(jnp.float32(fan_in))
        w = jax.random.uniform(kw, (fan_out, fan_in), jnp.float32, -bound, bound)
        b = jax.random.uniform(kb, (fan_out,), jnp.float32, -bound, bound)
        return w, b

    keys = jax.random.split(key, 5)
    w1, b1 = linear(keys[0], 1, hidden)
    w2, b2 = linear(keys[1], hidden, hidden)
    w3, b3 = linear(keys[2], hidden, hidden)
    w4, b4 = linear(keys[3], hidden, hidden)
    w5, b5 = linear(keys[4], hidden, 1)
    return dict(w1=w1, b1=b1, w2=w2, b2=b2, w3=w3, b3=b3,
                w4=w4, b4=b4, w5=w5, b5=b5)


def deepset_reference(x, p):
    """Pure-JAX replica of the PyTorch forward for correctness checking."""
    h = jax.nn.relu(x @ p["w1"].T + p["b1"])
    h = jax.nn.relu(h @ p["w2"].T + p["b2"])
    m = h.mean(axis=1)
    c = jax.nn.relu(m @ p["w3"].T + p["b3"])
    c = jax.nn.relu(c @ p["w4"].T + p["b4"])
    return (c @ p["w5"].T + p["b5"]).reshape(-1)


if __name__ == "__main__":
    key = jax.random.PRNGKey(0)
    k_x, k_p, k_x2 = jax.random.split(key, 3)

    batch, n_support, dim, hidden = 2, 8, 1, 32
    x = jax.random.normal(k_x, (batch, n_support, dim), jnp.float32)
    params = init_params(k_p, hidden)
    ref = deepset_reference(x, params)

    # f32 matmul inputs: bit-close to the reference.
    preds_f32 = jax.block_until_ready(
        deepset_forward(x, params, matmul_dtype=jnp.float32))
    assert preds_f32.shape == (batch,)
    assert jnp.allclose(preds_f32, ref, atol=1e-3, rtol=1e-3), (preds_f32, ref)

    # Default path: bf16 matmul inputs, f32 accumulation (all generations).
    preds = jax.block_until_ready(deepset_forward(x, params))
    assert jnp.allclose(preds, ref, atol=5e-2, rtol=5e-2), (preds, ref)

    # Multi-block grid (exercises batch tiling / padding path).
    big_batch = 300
    xb = jax.random.normal(k_x2, (big_batch, n_support, dim), jnp.float32)
    refb = deepset_reference(xb, params)
    predsb = jax.block_until_ready(deepset_forward(xb, params))
    assert predsb.shape == (big_batch,)
    assert jnp.allclose(predsb, refb, atol=5e-2, rtol=5e-2)

    print("KERNEL_OK")
</pallas_src>

<mosaic_0001>
module attributes {stable_mosaic.version = 11 : i64} {
  func.func @deepset_kernel(%arg0: i32, %arg1: memref<1x1024xf32, #tpu.memory_space<vmem>>, %arg2: memref<32x1xf32, #tpu.memory_space<vmem>>, %arg3: memref<32x1xf32, #tpu.memory_space<vmem>>, %arg4: memref<32x32xf32, #tpu.memory_space<vmem>>, %arg5: memref<32x1xf32, #tpu.memory_space<vmem>>, %arg6: memref<32x32xf32, #tpu.memory_space<vmem>>, %arg7: memref<32x1xf32, #tpu.memory_space<vmem>>, %arg8: memref<32x32xf32, #tpu.memory_space<vmem>>, %arg9: memref<32x1xf32, #tpu.memory_space<vmem>>, %arg10: memref<32x1xf32, #tpu.memory_space<vmem>>, %arg11: memref<1x1xf32, #tpu.memory_space<vmem>>, %arg12: memref<1x128xf32, #tpu.memory_space<vmem>>) attributes {dimension_semantics = [#tpu.dimension_semantics<parallel>], iteration_bounds = array<i64: 1>, scalar_prefetch = 0 : i64, scratch_operands = 0 : i64, tpu.core_type = #tpu.core_type<tc>, window_params = [{transform_indices = @transform_0, window_bounds = array<i64: 1, 1024>}, {pipeline_mode = #tpu.pipeline_mode<synchronous>, transform_indices = @transform_1, window_bounds = array<i64: 32, 1>}, {pipeline_mode = #tpu.pipeline_mode<synchronous>, transform_indices = @transform_2, window_bounds = array<i64: 32, 1>}, {pipeline_mode = #tpu.pipeline_mode<synchronous>, transform_indices = @transform_3, window_bounds = array<i64: 32, 32>}, {pipeline_mode = #tpu.pipeline_mode<synchronous>, transform_indices = @transform_4, window_bounds = array<i64: 32, 1>}, {pipeline_mode = #tpu.pipeline_mode<synchronous>, transform_indices = @transform_5, window_bounds = array<i64: 32, 32>}, {pipeline_mode = #tpu.pipeline_mode<synchronous>, transform_indices = @transform_6, window_bounds = array<i64: 32, 1>}, {pipeline_mode = #tpu.pipeline_mode<synchronous>, transform_indices = @transform_7, window_bounds = array<i64: 32, 32>}, {pipeline_mode = #tpu.pipeline_mode<synchronous>, transform_indices = @transform_8, window_bounds = array<i64: 32, 1>}, {pipeline_mode = #tpu.pipeline_mode<synchronous>, transform_indices = @transform_9, window_bounds = array<i64: 32, 1>}, {pipeline_mode = #tpu.pipeline_mode<synchronous>, transform_indices = @transform_10, window_bounds = array<i64: 1, 1>}, {transform_indices = @transform_11, window_bounds = array<i64: 1, 128>}]} {
    %c0 = arith.constant 0 : index
    %c0_0 = arith.constant 0 : index
    %0 = vector.load %arg1[%c0, %c0_0] : memref<1x1024xf32, #tpu.memory_space<vmem>>, vector<1x1024xf32>
    %c0_1 = arith.constant 0 : index
    %c0_2 = arith.constant 0 : index
    %1 = vector.load %arg2[%c0_1, %c0_2] : memref<32x1xf32, #tpu.memory_space<vmem>>, vector<32x1xf32>
    %2 = vector.broadcast %1 : vector<32x1xf32> to vector<32x1024xf32>
    %3 = vector.broadcast %0 : vector<1x1024xf32> to vector<32x1024xf32>
    %4 = arith.mulf %2, %3 : vector<32x1024xf32>
    %c0_3 = arith.constant 0 : index
    %c0_4 = arith.constant 0 : index
    %5 = vector.load %arg3[%c0_3, %c0_4] : memref<32x1xf32, #tpu.memory_space<vmem>>, vector<32x1xf32>
    %6 = vector.broadcast %5 : vector<32x1xf32> to vector<32x1024xf32>
    %7 = arith.addf %4, %6 : vector<32x1024xf32>
    %cst = arith.constant 0.000000e+00 : f32
    %8 = vector.broadcast %cst : f32 to vector<32x1024xf32>
    %9 = arith.maximumf %7, %8 : vector<32x1024xf32>
    %c0_5 = arith.constant 0 : index
    %c0_6 = arith.constant 0 : index
    %10 = vector.load %arg4[%c0_5, %c0_6] : memref<32x32xf32, #tpu.memory_space<vmem>>, vector<32x32xf32>
    %cst_7 = arith.constant dense<0.000000e+00> : vector<32x1024xf32>
    %11 = tpu.matmul %10, %9, %cst_7 {dimension_numbers = #tpu.dot_dimension_numbers<[1], [0], [0], [1], [0, 0, 1, 1], [], []>} : vector<32x32xf32>, vector<32x1024xf32>, vector<32x1024xf32> -> vector<32x1024xf32>
    %c0_8 = arith.constant 0 : index
    %c0_9 = arith.constant 0 : index
    %12 = vector.load %arg5[%c0_8, %c0_9] : memref<32x1xf32, #tpu.memory_space<vmem>>, vector<32x1xf32>
    %13 = vector.broadcast %12 : vector<32x1xf32> to vector<32x1024xf32>
    %14 = arith.addf %11, %13 : vector<32x1024xf32>
    %cst_10 = arith.constant 0.000000e+00 : f32
    %15 = vector.broadcast %cst_10 : f32 to vector<32x1024xf32>
    %16 = arith.maximumf %14, %15 : vector<32x1024xf32>
    %17 = vector.extract_strided_slice %16 {offsets = [0, 0], sizes = [32, 128], strides = [1, 1]} : vector<32x1024xf32> to vector<32x128xf32>
    %18 = vector.extract_strided_slice %16 {offsets = [0, 128], sizes = [32, 128], strides = [1, 1]} : vector<32x1024xf32> to vector<32x128xf32>
    %19 = arith.addf %17, %18 : vector<32x128xf32>
    %20 = vector.extract_strided_slice %16 {offsets = [0, 256], sizes = [32, 128], strides = [1, 1]} : vector<32x1024xf32> to vector<32x128xf32>
    %21 = arith.addf %19, %20 : vector<32x128xf32>
    %22 = vector.extract_strided_slice %16 {offsets = [0, 384], sizes = [32, 128], strides = [1, 1]} : vector<32x1024xf32> to vector<32x128xf32>
    %23 = arith.addf %21, %22 : vector<32x128xf32>
    %24 = vector.extract_strided_slice %16 {offsets = [0, 512], sizes = [32, 128], strides = [1, 1]} : vector<32x1024xf32> to vector<32x128xf32>
    %25 = arith.addf %23, %24 : vector<32x128xf32>
    %26 = vector.extract_strided_slice %16 {offsets = [0, 640], sizes = [32, 128], strides = [1, 1]} : vector<32x1024xf32> to vector<32x128xf32>
    %27 = arith.addf %25, %26 : vector<32x128xf32>
    %28 = vector.extract_strided_slice %16 {offsets = [0, 768], sizes = [32, 128], strides = [1, 1]} : vector<32x1024xf32> to vector<32x128xf32>
    %29 = arith.addf %27, %28 : vector<32x128xf32>
    %30 = vector.extract_strided_slice %16 {offsets = [0, 896], sizes = [32, 128], strides = [1, 1]} : vector<32x1024xf32> to vector<32x128xf32>
    %31 = arith.addf %29, %30 : vector<32x128xf32>
    %cst_11 = arith.constant 1.250000e-01 : f32
    %32 = vector.broadcast %cst_11 : f32 to vector<32x128xf32>
    %33 = arith.mulf %31, %32 : vector<32x128xf32>
    %c0_12 = arith.constant 0 : index
    %c0_13 = arith.constant 0 : index
    %34 = vector.load %arg6[%c0_12, %c0_13] : memref<32x32xf32, #tpu.memory_space<vmem>>, vector<32x32xf32>
    %cst_14 = arith.constant dense<0.000000e+00> : vector<32x128xf32>
    %35 = tpu.matmul %34, %33, %cst_14 {dimension_numbers = #tpu.dot_dimension_numbers<[1], [0], [0], [1], [0, 0, 1, 1], [], []>} : vector<32x32xf32>, vector<32x128xf32>, vector<32x128xf32> -> vector<32x128xf32>
    %c0_15 = arith.constant 0 : index
    %c0_16 = arith.constant 0 : index
    %36 = vector.load %arg7[%c0_15, %c0_16] : memref<32x1xf32, #tpu.memory_space<vmem>>, vector<32x1xf32>
    %37 = vector.broadcast %36 : vector<32x1xf32> to vector<32x128xf32>
    %38 = arith.addf %35, %37 : vector<32x128xf32>
    %cst_17 = arith.constant 0.000000e+00 : f32
    %39 = vector.broadcast %cst_17 : f32 to vector<32x128xf32>
    %40 = arith.maximumf %38, %39 : vector<32x128xf32>
    %c0_18 = arith.constant 0 : index
    %c0_19 = arith.constant 0 : index
    %41 = vector.load %arg8[%c0_18, %c0_19] : memref<32x32xf32, #tpu.memory_space<vmem>>, vector<32x32xf32>
    %cst_20 = arith.constant dense<0.000000e+00> : vector<32x128xf32>
    %42 = tpu.matmul %41, %40, %cst_20 {dimension_numbers = #tpu.dot_dimension_numbers<[1], [0], [0], [1], [0, 0, 1, 1], [], []>} : vector<32x32xf32>, vector<32x128xf32>, vector<32x128xf32> -> vector<32x128xf32>
    %c0_21 = arith.constant 0 : index
    %c0_22 = arith.constant 0 : index
    %43 = vector.load %arg9[%c0_21, %c0_22] : memref<32x1xf32, #tpu.memory_space<vmem>>, vector<32x1xf32>
    %44 = vector.broadcast %43 : vector<32x1xf32> to vector<32x128xf32>
    %45 = arith.addf %42, %44 : vector<32x128xf32>
    %cst_23 = arith.constant 0.000000e+00 : f32
    %46 = vector.broadcast %cst_23 : f32 to vector<32x128xf32>
    %47 = arith.maximumf %45, %46 : vector<32x128xf32>
    %c0_24 = arith.constant 0 : index
    %c0_25 = arith.constant 0 : index
    %48 = vector.load %arg10[%c0_24, %c0_25] : memref<32x1xf32, #tpu.memory_space<vmem>>, vector<32x1xf32>
    %49 = vector.broadcast %48 : vector<32x1xf32> to vector<32x128xf32>
    %50 = arith.mulf %47, %49 : vector<32x128xf32>
    %cst_26 = arith.constant dense<0.000000e+00> : vector<128xf32>
    %51 = vector.multi_reduction <add>, %50, %cst_26 [0] : vector<32x128xf32> to vector<128xf32>
    %52 = vector.shape_cast %51 : vector<128xf32> to vector<1x128xf32>
    %c0_27 = arith.constant 0 : index
    %c0_28 = arith.constant 0 : index
    %53 = vector.load %arg11[%c0_27, %c0_28] : memref<1x1xf32, #tpu.memory_space<vmem>>, vector<1x1xf32>
    %54 = vector.broadcast %53 : vector<1x1xf32> to vector<1x128xf32>
    %55 = arith.addf %52, %54 : vector<1x128xf32>
    %c0_29 = arith.constant 0 : index
    %c0_30 = arith.constant 0 : index
    %56 = vector.load %arg12[%c0_29, %c0_30] : memref<1x128xf32, #tpu.memory_space<vmem>>, vector<1x128xf32>
    tpu.vector_store %arg12[%c0_29, %c0_30], %55 {strides = array<i32>} : memref<1x128xf32, #tpu.memory_space<vmem>>, vector<1x128xf32>,
    return
  }
  func.func @transform_0(%arg0: i32) -> (i32, i32) {
    %c0_i32 = arith.constant 0 : i32
    %c0_i32_0 = arith.constant 0 : i32
    return %c0_i32, %arg0 : i32, i32
  }
  func.func @transform_1(%arg0: i32) -> (i32, i32) {
    %c0_i32 = arith.constant 0 : i32
    %c0_i32_0 = arith.constant 0 : i32
    %c0_i32_1 = arith.constant 0 : i32
    return %c0_i32, %c0_i32_0 : i32, i32
  }
  func.func @transform_2(%arg0: i32) -> (i32, i32) {
    %c0_i32 = arith.constant 0 : i32
    %c0_i32_0 = arith.constant 0 : i32
    %c0_i32_1 = arith.constant 0 : i32
    return %c0_i32, %c0_i32_0 : i32, i32
  }
  func.func @transform_3(%arg0: i32) -> (i32, i32) {
    %c0_i32 = arith.constant 0 : i32
    %c0_i32_0 = arith.constant 0 : i32
    %c0_i32_1 = arith.constant 0 : i32
    return %c0_i32, %c0_i32_0 : i32, i32
  }
  func.func @transform_4(%arg0: i32) -> (i32, i32) {
    %c0_i32 = arith.constant 0 : i32
    %c0_i32_0 = arith.constant 0 : i32
    %c0_i32_1 = arith.constant 0 : i32
    return %c0_i32, %c0_i32_0 : i32, i32
  }
  func.func @transform_5(%arg0: i32) -> (i32, i32) {
    %c0_i32 = arith.constant 0 : i32
    %c0_i32_0 = arith.constant 0 : i32
    %c0_i32_1 = arith.constant 0 : i32
    return %c0_i32, %c0_i32_0 : i32, i32
  }
  func.func @transform_6(%arg0: i32) -> (i32, i32) {
    %c0_i32 = arith.constant 0 : i32
    %c0_i32_0 = arith.constant 0 : i32
    %c0_i32_1 = arith.constant 0 : i32
    return %c0_i32, %c0_i32_0 : i32, i32
  }
  func.func @transform_7(%arg0: i32) -> (i32, i32) {
    %c0_i32 = arith.constant 0 : i32
    %c0_i32_0 = arith.constant 0 : i32
    %c0_i32_1 = arith.constant 0 : i32
    return %c0_i32, %c0_i32_0 : i32, i32
  }
  func.func @transform_8(%arg0: i32) -> (i32, i32) {
    %c0_i32 = arith.constant 0 : i32
    %c0_i32_0 = arith.constant 0 : i32
    %c0_i32_1 = arith.constant 0 : i32
    return %c0_i32, %c0_i32_0 : i32, i32
  }
  func.func @transform_9(%arg0: i32) -> (i32, i32) {
    %c0_i32 = arith.constant 0 : i32
    %c0_i32_0 = arith.constant 0 : i32
    %c0_i32_1 = arith.constant 0 : i32
    return %c0_i32, %c0_i32_0 : i32, i32
  }
  func.func @transform_10(%arg0: i32) -> (i32, i32) {
    %c0_i32 = arith.constant 0 : i32
    %c0_i32_0 = arith.constant 0 : i32
    %c0_i32_1 = arith.constant 0 : i32
    return %c0_i32, %c0_i32_0 : i32, i32
  }
  func.func @transform_11(%arg0: i32) -> (i32, i32) {
    %c0_i32 = arith.constant 0 : i32
    %c0_i32_0 = arith.constant 0 : i32
    return %c0_i32, %arg0 : i32, i32
  }
}

</mosaic_0001>

<bundles_post_ra>
// kernel: tpu_custom_call.1
= control target key start
LH: loop header
LB: loop body
LE: loop exit
PB: predicated region body
PF: predicated region fallthrough
CT: control target
= control target key end

     0   :  { %s1219_s0 = inlined_call_operand.vmem [shape: f32[1,1024], index: 0, kind: input, shape index: {}]   ;;  %s1220_s1 = inlined_call_operand.vmem [shape: f32[32,1], index: 1, kind: input, shape index: {}]   ;;  %s1221_s2 = inlined_call_operand.vmem [shape: f32[32,1], index: 2, kind: input, shape index: {}]   ;;  %s1222_s3 = inlined_call_operand.vmem [shape: f32[32,32], index: 3, kind: input, shape index: {}]   ;;  %s1223_s4 = inlined_call_operand.vmem [shape: f32[32,1], index: 4, kind: input, shape index: {}]   ;;  %s1224_s5 = inlined_call_operand.vmem [shape: f32[32,32], index: 5, kind: input, shape index: {}]   ;;  %s1225_s6 = inlined_call_operand.vmem [shape: f32[32,1], index: 6, kind: input, shape index: {}]   ;;  %s1226_s7 = inlined_call_operand.vmem [shape: f32[32,32], index: 7, kind: input, shape index: {}]   ;;  %s1227_s8 = inlined_call_operand.vmem [shape: f32[32,1], index: 8, kind: input, shape index: {}]   ;;  %s1228_s9 = inlined_call_operand.vmem [shape: f32[32,1], index: 9, kind: input, shape index: {}]   ;;  %s1229_s10 = inlined_call_operand.<no memory space> [shape: f32[1,1], index: 10, kind: input, shape index: {}]   ;;  %s1230_s11 = inlined_call_operand.hbm [shape: f32[1,128], index: 11, kind: output, shape index: {}]  }
   0x1   :  { %v16_v0 = vstv %s1229_s10 }
   0x2   :  { %17 = vst [vmem:[#allocation2] sm:$0x1] %v16_v0 }
   0x3   :  { %v117_v1 = vld [vmem:[%s1221_s2 + $0x10] sm:$0xff]  ;;  %v118_v2 = vld [vmem:[%s1221_s2 + $0x18] sm:$0xff]  ;;  %v827_v4 = vmov 0  }
   0x4   :  { %v45_v3 = vld [vmem:[%s1220_s1 + $0x18] sm:$0xff]  ;;  %800 = vset.pattern.permute.xlu2 %v827_v4  ;;  %799 = vset.pattern.permute.xlu1 %v827_v4 }
   0x5   :  { %798 = vset.pattern.permute.xlu0 %v827_v4  ;;  %131 = vperm.xlu2 %800, %v117_v1  }
   0x6   :  { %136 = vperm.xlu1 %799, %v118_v2   ;;  %63 = vperm.xlu0 %798, %v45_v3  }
   0x7   :  { %18 = vsyncpa [#allocation4], 0  ;;  %v42_v5 = vld [vmem:[%s1220_s1] sm:$0xff]  ;;  %v44_v6 = vld [vmem:[%s1220_s1 + $0x10] sm:$0xff]  ;;  %vm231_vm0 = vcmask 261120  }
   0x8   :  { %v43_v7 = vld [vmem:[%s1220_s1 + $0x8] sm:$0xff]  ;;  %v210_v8 = vld [vmem:[%s1223_s4 + $0x18] sm:$0xff]  ;;  %v115_v10 = vld [vmem:[%s1221_s2] sm:$0xff] }
   0x9   :  { %v116_v9 = vld [vmem:[%s1221_s2 + $0x8] sm:$0xff]  ;;  %v207_v11 = vld [vmem:[%s1223_s4] sm:$0xff]  ;;  %v209_v12 = vld [vmem:[%s1223_s4 + $0x10] sm:$0xff] }
   0xa   :  { %v208_v13 = vld [vmem:[%s1223_s4 + $0x8] sm:$0xff]  ;;  %v547_v15 = vld [vmem:[%s1225_s6 + $0x18] sm:$0xff]  ;;  %v546_v16 = vld [vmem:[%s1225_s6 + $0x10] sm:$0xff] }
   0xb   :  { %v545_v14 = vld [vmem:[%s1225_s6 + $0x8] sm:$0xff]  ;;  %v544_v18 = vld [vmem:[%s1225_s6] sm:$0xff]  ;;  %v619_v21 = vld [vmem:[%s1227_s8 + $0x10] sm:$0xff] }
   0xc   :  { %v618_v17 = vld [vmem:[%s1227_s8 + $0x8] sm:$0xff]  ;;  %v617_v19 = vld [vmem:[%s1227_s8] sm:$0xff]  ;;  %v620_v22 = vld [vmem:[%s1227_s8 + $0x18] sm:$0xff]  ;;  %s739_s8 = sshll.u32 %s1230_s11, 4  ;;  %s740_s8 = int_to_ptr.hbm [resolvable:$true] %s739_s8 }
   0xd   :  { %48 = vperm.xlu2 %800, %v42_v5   ;;  %v686_v20 = vld [vmem:[%s1228_s9] sm:$0xff]  ;;  %v689_v23 = vld [vmem:[%s1228_s9 + $0x18] sm:$0xff]  ;;  %v687_v24 = vld [vmem:[%s1228_s9 + $0x8] sm:$0xff] }
   0xe   :  { %58 = vperm.xlu0 %798, %v44_v6   ;;  %53 = vperm.xlu1 %799, %v43_v7   ;;  %v688_v25 = vld [vmem:[%s1228_s9 + $0x10] sm:$0xff]  ;;  %v723_v26 = vld [vmem:[#allocation2] sm:$0x1] }
   0xf   :  { %v41_v27 = vld [vmem:[%s1219_s0] sm:$0xff] }
  0x10   :  { %v67_v28 = vperm.slane %v41_v27, 0  ;;  %v68_v29 = vperm.slane %v41_v27, 1  ;;  %v69_v45 = vperm.slane %v41_v27, 2  ;;  %v70_v46 = vperm.slane %v41_v27, 3 }
  0x11   :  { %v71_v47 = vperm.slane %v41_v27, 4  ;;  %v72_v51 = vperm.slane %v41_v27, 5  ;;  %v995_v58 = vperm.slane %v41_v27, 6  ;;  %v1004_v0 = vperm.slane %v41_v27, 7 }
  0x15   :  { %228 = vperm.xlu2 %800, %v210_v8  }
  0x16   :  { %126 = vperm.xlu0 %798, %v116_v9   ;;  %121 = vperm.xlu1 %799, %v115_v10  }
  0x1d   :  { %213 = vperm.xlu2 %800, %v207_v11  }
  0x1e   :  { %223 = vperm.xlu0 %798, %v209_v12   ;;  %218 = vperm.xlu1 %799, %v208_v13  }
  0x25   :  { %555 = vperm.xlu2 %800, %v545_v14  }
  0x26   :  { %565 = vperm.xlu0 %798, %v547_v15   ;;  %560 = vperm.xlu1 %799, %v546_v16  }
  0x2d   :  { %628 = vperm.xlu2 %800, %v618_v17  }
  0x2e   :  { %550 = vperm.xlu0 %798, %v544_v18   ;;  %623 = vperm.xlu1 %799, %v617_v19  }
  0x35   :  { %692 = vperm.xlu2 %800, %v686_v20  }
  0x36   :  { %633 = vperm.xlu0 %798, %v619_v21   ;;  %638 = vperm.xlu1 %799, %v620_v22   ;;  %v1026_v21 = vld [vmem:[%s1222_s3] sm:$0xff]  ;;  %v1031_v22 = vld [vmem:[%s1222_s3 + $0x10] sm:$0xff] }
  0x3d   :  { %707 = vperm.xlu2 %800, %v689_v23  }
  0x3e   :  { %697 = vperm.xlu0 %798, %v687_v24   ;;  %702 = vperm.xlu1 %799, %v688_v25  }
  0x46   :  { %726 = vperm.xlu0 %798, %v723_v26  }
  0x5f   :  { %v973_v34 = vpop.permute.xlu2 %131 }
  0x67   :  { %v985_v48 = vpop.permute.xlu2 %48 }
  0x68   :  { %v83_v52 = vmul.f32 %v67_v28, %v985_v48  ;;  %v84_v53 = vmul.f32 %v68_v29, %v985_v48  ;;  %v990_v54 = vmul.f32 %v69_v45, %v985_v48  ;;  %v86_v63 = vmul.f32 %v70_v46, %v985_v48 }
  0x69   :  { %v87_v8 = vmul.f32 %v71_v47, %v985_v48  ;;  %v88_v15 = vmul.f32 %v72_v51, %v985_v48 }
  0x78   :  { %v967_v30 = vpop.permute.xlu1 %136  ;;  %v969_v31 = vpop.permute.xlu0 %63 }
  0x79   :  { %v107_v32 = vmul.f32 %v67_v28, %v969_v31  ;;  %v108_v33 = vmul.f32 %v68_v29, %v969_v31  ;;  %v109_v57 = vmul.f32 %v69_v45, %v969_v31  ;;  %v110_v61 = vmul.f32 %v70_v46, %v969_v31 }
  0x7a   :  { %v111_v62 = vmul.f32 %v71_v47, %v969_v31  ;;  %v112_v4 = vmul.f32 %v72_v51, %v969_v31  ;;  %v113_v19 = vmul.f32 %v995_v58, %v969_v31  ;;  %v114_v25 = vmul.f32 %v1004_v0, %v969_v31 }
  0x7b   :  { %v163_v35 = vadd.f32 %v967_v30, %v107_v32  ;;  %v164_v36 = vadd.f32 %v967_v30, %v108_v33  ;;  %v165_v11 = vadd.f32 %v967_v30, %v109_v57  ;;  %v166_v13 = vadd.f32 %v967_v30, %v110_v61 }
  0x7c   :  { %v167_v17 = vadd.f32 %v967_v30, %v111_v62  ;;  %v168_v18 = vadd.f32 %v967_v30, %v112_v4  ;;  %v170_v61 = vadd.f32 %v967_v30, %v114_v25 }
  0x7d   :  { %v195_v37 = vmax.f32 %v163_v35, 0.0  ;;  %v196_v38 = vmax.f32 %v164_v36, 0.0  ;;  %v197_v26 = vmax.f32 %v165_v11, 0.0  ;;  %v198_v32 = vmax.f32 %v166_v13, 0.0 }
  0x7e   :  { %v199_v31 = vmax.f32 %v167_v17, 0.0 }
  0x7f   :  { %256 = vmatpush.msra.mxu0 %v195_v37  ;;  %788 = vmatpush.msra.mxu2 %v195_v37  ;;  %v200_v37 = vmax.f32 %v168_v18, 0.0 }
  0x80   :  { %285 = vmatpush.msra.mxu1 %v196_v38  ;;  %792 = vmatpush.msra.mxu3 %v196_v38  ;;  %v977_v39 = vpop.permute.xlu0 %58  ;;  %v979_v40 = vpop.permute.xlu1 %53 }
  0x81   :  { %v99_v41 = vmul.f32 %v67_v28, %v977_v39  ;;  %v100_v42 = vmul.f32 %v68_v29, %v977_v39  ;;  %v91_v55 = vmul.f32 %v67_v28, %v979_v40  ;;  %v92_v56 = vmul.f32 %v68_v29, %v979_v40 }
  0x82   :  { %v101_v6 = vmul.f32 %v69_v45, %v977_v39  ;;  %v102_v7 = vmul.f32 %v70_v46, %v977_v39  ;;  %v103_v12 = vmul.f32 %v71_v47, %v977_v39  ;;  %v104_v14 = vmul.f32 %v72_v51, %v977_v39 }
  0x83   :  { %v155_v43 = vadd.f32 %v973_v34, %v99_v41  ;;  %v156_v44 = vadd.f32 %v973_v34, %v100_v42  ;;  %v93_v28 = vmul.f32 %v69_v45, %v979_v40  ;;  %v94_v29 = vmul.f32 %v70_v46, %v979_v40 }
  0x84   :  { %v157_v23 = vadd.f32 %v973_v34, %v101_v6  ;;  %v158_v24 = vadd.f32 %v973_v34, %v102_v7  ;;  %v159_v27 = vadd.f32 %v973_v34, %v103_v12  ;;  %v160_v33 = vadd.f32 %v973_v34, %v104_v14 }
  0x85   :  { %v187_v49 = vmax.f32 %v155_v43, 0.0  ;;  %v188_v50 = vmax.f32 %v156_v44, 0.0  ;;  %v95_v35 = vmul.f32 %v71_v47, %v979_v40  ;;  %v96_v36 = vmul.f32 %v72_v51, %v979_v40 }
  0x86   :  { %v189_v42 = vmax.f32 %v157_v23, 0.0  ;;  %v190_v43 = vmax.f32 %v158_v24, 0.0  ;;  %v191_v46 = vmax.f32 %v159_v27, 0.0  ;;  %v192_v51 = vmax.f32 %v160_v33, 0.0 }
  0x87   :  { %257 = vmatpush.msra.mxu0 %v187_v49  ;;  %789 = vmatpush.msra.mxu2 %v187_v49  ;;  %v90_v12 = vmul.f32 %v1004_v0, %v985_v48 }
  0x88   :  { %286 = vmatpush.msra.mxu1 %v188_v50  ;;  %793 = vmatpush.msra.mxu3 %v188_v50  ;;  %v997_v59 = vpop.permute.xlu0 %126  ;;  %v999_v60 = vpop.permute.xlu1 %121  ;;  %v105_v50 = vmul.f32 %v995_v58, %v977_v39 }
  0x89   :  { %v147_v1 = vadd.f32 %v997_v59, %v91_v55  ;;  %v148_v2 = vadd.f32 %v997_v59, %v92_v56  ;;  %v139_v3 = vadd.f32 %v999_v60, %v83_v52  ;;  %v140_v5 = vadd.f32 %v999_v60, %v84_v53 }
  0x8a   :  { %v149_v38 = vadd.f32 %v997_v59, %v93_v28  ;;  %v150_v41 = vadd.f32 %v997_v59, %v94_v29  ;;  %v151_v44 = vadd.f32 %v997_v59, %v95_v35  ;;  %v152_v45 = vadd.f32 %v997_v59, %v96_v36 }
  0x8b   :  { %v179_v9 = vmax.f32 %v147_v1, 0.0  ;;  %v180_v10 = vmax.f32 %v148_v2, 0.0  ;;  %v171_v16 = vmax.f32 %v139_v3, 0.0  ;;  %v172_v20 = vmax.f32 %v140_v5, 0.0 }
  0x8c   :  { %v141_v47 = vadd.f32 %v999_v60, %v990_v54  ;;  %v142_v49 = vadd.f32 %v999_v60, %v86_v63  ;;  %v143_v52 = vadd.f32 %v999_v60, %v87_v8  ;;  %v144_v53 = vadd.f32 %v999_v60, %v88_v15 }
  0x8d   :  { %258 = vmatpush.msra.mxu0 %v179_v9  ;;  %790 = vmatpush.msra.mxu2 %v179_v9  ;;  %v106_v55 = vmul.f32 %v1004_v0, %v977_v39  ;;  %v181_v56 = vmax.f32 %v149_v38, 0.0  ;;  %v182_v57 = vmax.f32 %v150_v41, 0.0  ;;  %v169_v54 = vadd.f32 %v967_v30, %v113_v19  ;;  %v204_v9 = vld [vmem:[%s1222_s3 + $0x8] sm:$0xff] }
  0x8e   :  { %287 = vmatpush.msra.mxu1 %v180_v10  ;;  %794 = vmatpush.msra.mxu3 %v180_v10  ;;  %v183_v62 = vmax.f32 %v151_v44, 0.0  ;;  %v184_v63 = vmax.f32 %v152_v45, 0.0  ;;  %v173_v1 = vmax.f32 %v141_v47, 0.0  ;;  %v174_v2 = vmax.f32 %v142_v49, 0.0 }
  0x8f   :  { %259 = vmatpush.msra.mxu0 %v171_v16  ;;  %791 = vmatpush.msra.mxu2 %v171_v16  ;;  %v97_v3 = vmul.f32 %v995_v58, %v979_v40  ;;  %v98_v39 = vmul.f32 %v1004_v0, %v979_v40  ;;  %v175_v4 = vmax.f32 %v143_v52, 0.0  ;;  %v176_v5 = vmax.f32 %v144_v53, 0.0  ;;  %v206_v40 = vld [vmem:[%s1222_s3 + $0x18] sm:$0xff] }
  0x90   :  { %288 = vmatpush.msra.mxu1 %v172_v20  ;;  %795 = vmatpush.msra.mxu3 %v172_v20  ;;  %v161_v30 = vadd.f32 %v973_v34, %v105_v50  ;;  %v162_v6 = vadd.f32 %v973_v34, %v106_v55  ;;  %v201_v7 = vmax.f32 %v169_v54, 0.0  ;;  %v202_v8 = vmax.f32 %v170_v61, 0.0  ;;  %v1140_v44 = vpop.permute.xlu1 %218 }
  0x91   :  { %748 = vmatmul.msk.f32.vlgmr.msra.gmra.mxu0 %vm231_vm0, %v1026_v21  ;;  %750 = vmatmul.msk.f32.vlgmr.msra.gmra.mxu2 %vm231_vm0, %v1031_v22  ;;  %v89_v10 = vmul.f32 %v995_v58, %v985_v48  ;;  %v153_v11 = vadd.f32 %v997_v59, %v97_v3  ;;  %v154_v34 = vadd.f32 %v997_v59, %v98_v39 }
  0x92   :  { %752 = vmatmul.msk.f32.vlgmr.msra.gmra.mxu1 %vm231_vm0, %v1026_v21  ;;  %754 = vmatmul.msk.f32.vlgmr.msra.gmra.mxu3 %vm231_vm0, %v1031_v22  ;;  %v193_v13 = vmax.f32 %v161_v30, 0.0  ;;  %v194_v14 = vmax.f32 %v162_v6, 0.0  ;;  %v146_v58 = vadd.f32 %v999_v60, %v90_v12 }
  0x93   :  { %314 = vmatpush.msrb.mxu2 %v197_v26  ;;  %343 = vmatpush.msrb.mxu3 %v198_v32  ;;  %v145_v15 = vadd.f32 %v999_v60, %v89_v10  ;;  %v185_v59 = vmax.f32 %v153_v11, 0.0  ;;  %v186_v48 = vmax.f32 %v154_v34, 0.0 }
  0x94   :  { %372 = vmatpush.msrb.mxu0 %v199_v31  ;;  %401 = vmatpush.msrb.mxu1 %v200_v37  ;;  %v178_v16 = vmax.f32 %v146_v58, 0.0  ;;  %v1130_v37 = vpop.permute.xlu2 %228 }
  0x95   :  { %315 = vmatpush.msrb.mxu2 %v189_v42  ;;  %344 = vmatpush.msrb.mxu3 %v190_v43  ;;  %v177_v0 = vmax.f32 %v145_v15, 0.0  ;;  %v1138_v43 = vpop.permute.xlu0 %223 }
  0x96   :  { %373 = vmatpush.msrb.mxu0 %v191_v46  ;;  %402 = vmatpush.msrb.mxu1 %v192_v51 }
  0x97   :  { %316 = vmatpush.msrb.mxu2 %v181_v56  ;;  %345 = vmatpush.msrb.mxu3 %v182_v57 }
  0x98   :  { %374 = vmatpush.msrb.mxu0 %v183_v62  ;;  %403 = vmatpush.msrb.mxu1 %v184_v63 }
  0x99   :  { %317 = vmatpush.msrb.mxu2 %v173_v1  ;;  %346 = vmatpush.msrb.mxu3 %v174_v2 }
  0x9a   :  { %375 = vmatpush.msrb.mxu0 %v175_v4  ;;  %404 = vmatpush.msrb.mxu1 %v176_v5 }
  0x9b   :  { %430 = vmatpush.msra.mxu2 %v201_v7  ;;  %459 = vmatpush.msra.mxu3 %v202_v8 }
  0x9c   :  { %749 = vmatmul.msk.f32.gmra.mxu0 %vm231_vm0, %v204_v9  ;;  %751 = vmatmul.msk.f32.gmra.mxu2 %vm231_vm0, %v206_v40  ;;  %v1146_v51 = vpop.permute.xlu2 %213 }
  0x9d   :  { %753 = vmatmul.msk.f32.gmra.mxu1 %vm231_vm0, %v204_v9  ;;  %755 = vmatmul.msk.f32.gmra.mxu3 %vm231_vm0, %v206_v40 }
  0x9e   :  { %431 = vmatpush.msra.mxu2 %v193_v13  ;;  %460 = vmatpush.msra.mxu3 %v194_v14 }
  0xa0   :  { %432 = vmatpush.msra.mxu2 %v185_v59  ;;  %461 = vmatpush.msra.mxu3 %v186_v48 }
  0xa2   :  { %433 = vmatpush.msra.mxu2 %v177_v0  ;;  %462 = vmatpush.msra.mxu3 %v178_v16 }
  0xa4   :  { %756 = vmatmul.msk.f32.vlgmr.msrb.gmra.mxu2 %vm231_vm0, %v1026_v21  ;;  %764 = vmatmul.msk.f32.vlgmr.msrb.gmra.mxu0 %vm231_vm0, %v1026_v21 }
  0xa5   :  { %760 = vmatmul.msk.f32.vlgmr.msrb.gmra.mxu3 %vm231_vm0, %v1026_v21  ;;  %768 = vmatmul.msk.f32.vlgmr.msrb.gmra.mxu1 %vm231_vm0, %v1026_v21 }
  0xac   :  { %757 = vmatmul.msk.f32.gmra.mxu2 %vm231_vm0, %v204_v9  ;;  %765 = vmatmul.msk.f32.gmra.mxu0 %vm231_vm0, %v204_v9 }
  0xad   :  { %761 = vmatmul.msk.f32.gmra.mxu3 %vm231_vm0, %v204_v9  ;;  %769 = vmatmul.msk.f32.gmra.mxu1 %vm231_vm0, %v204_v9 }
  0xb4   :  { %758 = vmatmul.msk.f32.gmra.mxu2 %vm231_vm0, %v1031_v22  ;;  %766 = vmatmul.msk.f32.gmra.mxu0 %vm231_vm0, %v1031_v22 }
  0xb5   :  { %762 = vmatmul.msk.f32.gmra.mxu3 %vm231_vm0, %v1031_v22  ;;  %770 = vmatmul.msk.f32.gmra.mxu1 %vm231_vm0, %v1031_v22 }
  0xbc   :  { %759 = vmatmul.msk.f32.gmra.mxu2 %vm231_vm0, %v206_v40  ;;  %767 = vmatmul.msk.f32.gmra.mxu0 %vm231_vm0, %v206_v40 }
  0xbd   :  { %763 = vmatmul.msk.f32.gmra.mxu3 %vm231_vm0, %v206_v40  ;;  %771 = vmatmul.msk.f32.gmra.mxu1 %vm231_vm0, %v206_v40 }
  0xc4   :  { %772 = vmatmul.msk.f32.vlgmr.msra.gmra.mxu2 %vm231_vm0, %v1026_v21 }
  0xc5   :  { %776 = vmatmul.msk.f32.vlgmr.msra.gmra.mxu3 %vm231_vm0, %v1026_v21 }
  0xcc   :  { %773 = vmatmul.msk.f32.gmra.mxu2 %vm231_vm0, %v204_v9 }
  0xcd   :  { %777 = vmatmul.msk.f32.gmra.mxu3 %vm231_vm0, %v204_v9 }
  0xd4   :  { %774 = vmatmul.msk.f32.gmra.mxu2 %vm231_vm0, %v1031_v22 }
  0xd5   :  { %778 = vmatmul.msk.f32.gmra.mxu3 %vm231_vm0, %v1031_v22 }
  0xdc   :  { %775 = vmatmul.msk.f32.gmra.mxu2 %vm231_vm0, %v206_v40 }
  0xdd   :  { %779 = vmatmul.msk.f32.gmra.mxu3 %vm231_vm0, %v206_v40 }
 0x10e   :  { %v261_v20 = vpop.f32.mrf.mxu0 }
 0x10f   :  { %v290_v21 = vpop.f32.mrf.mxu1  ;;  %v262_v56 = vadd.f32 %v261_v20, %v1146_v51 }
 0x110   :  { %v291_v57 = vadd.f32 %v290_v21, %v1146_v51 }
 0x111   :  { %v476_v8 = vmax.f32 %v262_v56, 0.0 }
 0x112   :  { %v477_v9 = vmax.f32 %v291_v57, 0.0 }
 0x114   :  { %v267_v60 = vpop.f32.mrf.mxu2  ;;  %v508_v48 = vadd.f32 %v477_v9, %v476_v8 }
 0x115   :  { %v296_v17 = vpop.f32.mrf.mxu3  ;;  %v268_v45 = vadd.f32 %v267_v60, %v1138_v43 }
 0x116   :  { %v297_v46 = vadd.f32 %v296_v17, %v1138_v43 }
 0x117   :  { %v492_v61 = vmax.f32 %v268_v45, 0.0 }
 0x118   :  { %v493_v62 = vmax.f32 %v297_v46, 0.0 }
 0x119   :  { %v264_v25 = vpop.f32.mrf.mxu0 }
 0x11a   :  { %v293_v27 = vpop.f32.mrf.mxu1  ;;  %v265_v47 = vadd.f32 %v264_v25, %v1140_v44  ;;  %v510_v10 = vadd.f32 %v493_v62, %v492_v61 }
 0x11b   :  { %v294_v49 = vadd.f32 %v293_v27, %v1140_v44 }
 0x11c   :  { %v484_v2 = vmax.f32 %v265_v47, 0.0 }
 0x11d   :  { %v485_v3 = vmax.f32 %v294_v49, 0.0 }
 0x11f   :  { %v270_v18 = vpop.f32.mrf.mxu2  ;;  %v509_v12 = vadd.f32 %v485_v3, %v484_v2 }
 0x120   :  { %v299_v19 = vpop.f32.mrf.mxu3  ;;  %v271_v52 = vadd.f32 %v270_v18, %v1130_v37 }
 0x121   :  { %v1126_v29 = vpop.f32.mrf.mxu0  ;;  %v300_v53 = vadd.f32 %v299_v19, %v1130_v37 }
 0x122   :  { %v1128_v33 = vpop.f32.mrf.mxu1  ;;  %v500_v5 = vmax.f32 %v271_v52, 0.0 }
 0x123   :  { %v501_v30 = vmax.f32 %v300_v53, 0.0 }
 0x125   :  { %v511_v15 = vadd.f32 %v501_v30, %v500_v5 }
 0x127   :  { %v319_v23 = vpop.f32.mrf.mxu2 }
 0x128   :  { %v348_v24 = vpop.f32.mrf.mxu3  ;;  %v320_v39 = vadd.f32 %v319_v23, %v1146_v51 }
 0x129   :  { %v380_v31 = vpop.f32.mrf.mxu0  ;;  %v349_v0 = vadd.f32 %v348_v24, %v1146_v51  ;;  %v378_v24 = vadd.f32 %v1126_v29, %v1146_v51 }
 0x12a   :  { %v1132_v38 = vpop.f32.mrf.mxu1  ;;  %v478_v13 = vmax.f32 %v320_v39, 0.0  ;;  %v381_v21 = vadd.f32 %v380_v31, %v1140_v44 }
 0x12b   :  { %v410_v52 = vadd.f32 %v1132_v38, %v1140_v44  ;;  %v480_v29 = vmax.f32 %v378_v24, 0.0 }
 0x12c   :  { %v512_v20 = vadd.f32 %v508_v48, %v478_v13 }
 0x12d   :  { %v489_v39 = vmax.f32 %v410_v52, 0.0 }
 0x12f   :  { %v322_v26 = vpop.f32.mrf.mxu2 }
 0x130   :  { %v351_v28 = vpop.f32.mrf.mxu3  ;;  %v323_v54 = vadd.f32 %v322_v26, %v1140_v44 }
 0x131   :  { %v383_v50 = vpop.f32.mrf.mxu0  ;;  %v352_v14 = vadd.f32 %v351_v28, %v1140_v44 }
 0x132   :  { %v412_v63 = vpop.f32.mrf.mxu1  ;;  %v486_v40 = vmax.f32 %v323_v54, 0.0  ;;  %v384_v17 = vadd.f32 %v383_v50, %v1138_v43  ;;  %v488_v50 = vmax.f32 %v381_v21, 0.0  ;;  %v407_v54 = vadd.f32 %v1128_v33, %v1146_v51 }
 0x133   :  { %v487_v23 = vmax.f32 %v352_v14, 0.0  ;;  %v413_v46 = vadd.f32 %v412_v63, %v1138_v43 }
 0x134   :  { %v513_v16 = vadd.f32 %v509_v12, %v486_v40  ;;  %v496_v45 = vmax.f32 %v384_v17, 0.0  ;;  %v481_v40 = vmax.f32 %v407_v54, 0.0 }
 0x135   :  { %v497_v63 = vmax.f32 %v413_v46, 0.0 }
 0x137   :  { %v325_v32 = vpop.f32.mrf.mxu2 }
 0x138   :  { %v354_v22 = vpop.f32.mrf.mxu3  ;;  %v326_v55 = vadd.f32 %v325_v32, %v1138_v43 }
 0x139   :  { %v355_v11 = vadd.f32 %v354_v22, %v1138_v43  ;;  %v386_v60 = vpop.f32.mrf.mxu0 }
 0x13a   :  { %v494_v6 = vmax.f32 %v326_v55, 0.0  ;;  %v387_v27 = vadd.f32 %v386_v60, %v1130_v37  ;;  %v415_v28 = vpop.f32.mrf.mxu1 }
 0x13b   :  { %v495_v18 = vmax.f32 %v355_v11, 0.0  ;;  %v416_v53 = vadd.f32 %v415_v28, %v1130_v37 }
 0x13c   :  { %v514_v58 = vadd.f32 %v510_v10, %v494_v6  ;;  %v504_v56 = vmax.f32 %v387_v27, 0.0 }
 0x13d   :  { %v505_v38 = vmax.f32 %v416_v53, 0.0 }
 0x13e   :  { %v518_v26 = vadd.f32 %v514_v58, %v495_v18 }
 0x13f   :  { %v328_v35 = vpop.f32.mrf.mxu2 }
 0x140   :  { %v357_v36 = vpop.f32.mrf.mxu3  ;;  %v329_v1 = vadd.f32 %v328_v35, %v1130_v37  ;;  %v479_v35 = vmax.f32 %v349_v0, 0.0  ;;  %v522_v55 = vadd.f32 %v518_v26, %v496_v45  ;;  %v556_v45 = vpop.permute.xlu2 %555 }
 0x141   :  { %v358_v59 = vadd.f32 %v357_v36, %v1130_v37  ;;  %v517_v36 = vadd.f32 %v513_v16, %v487_v23  ;;  %v542_v23 = vld [vmem:[%s1224_s5 + $0x10] sm:$0xff] }
 0x142   :  { %v502_v34 = vmax.f32 %v329_v1, 0.0  ;;  %v516_v31 = vadd.f32 %v512_v20, %v479_v35  ;;  %v526_v6 = vadd.f32 %v522_v55, %v497_v63  ;;  %v613_v55 = vld [vmem:[%s1226_s7] sm:$0xff] }
 0x143   :  { %v503_v32 = vmax.f32 %v358_v59, 0.0  ;;  %v521_v61 = vadd.f32 %v517_v36, %v488_v50 }
 0x144   :  { %v515_v19 = vadd.f32 %v511_v15, %v502_v34  ;;  %v520_v3 = vadd.f32 %v516_v31, %v480_v29  ;;  %v616_v29 = vld [vmem:[%s1226_s7 + $0x18] sm:$0xff] }
 0x145   :  { %v525_v10 = vadd.f32 %v521_v61, %v489_v39 }
 0x146   :  { %v519_v47 = vadd.f32 %v515_v19, %v503_v32  ;;  %v524_v14 = vadd.f32 %v520_v3, %v481_v40  ;;  %v566_v32 = vpop.permute.xlu0 %565 }
 0x147   :  { %v1134_v41 = vpop.f32.mrf.mxu2 }
 0x148   :  { %v1136_v42 = vpop.f32.mrf.mxu3  ;;  %v436_v62 = vadd.f32 %v1134_v41, %v1146_v51  ;;  %v523_v1 = vadd.f32 %v519_v47, %v504_v56  ;;  %v614_v56 = vld [vmem:[%s1226_s7 + $0x8] sm:$0xff] }
 0x149   :  { %v465_v15 = vadd.f32 %v1136_v42, %v1146_v51  ;;  %v540_v42 = vld [vmem:[%s1224_s5] sm:$0xff]  ;;  %v541_v51 = vld [vmem:[%s1224_s5 + $0x8] sm:$0xff] }
 0x14a   :  { %v482_v33 = vmax.f32 %v436_v62, 0.0  ;;  %v527_v13 = vadd.f32 %v523_v1, %v505_v38  ;;  %v629_v62 = vpop.permute.xlu2 %628 }
 0x14b   :  { %v483_v18 = vmax.f32 %v465_v15, 0.0 }
 0x14c   :  { %v528_v0 = vadd.f32 %v524_v14, %v482_v33 }
 0x14e   :  { %v532_v20 = vadd.f32 %v528_v0, %v483_v18 }
 0x14f   :  { %v438_v4 = vpop.f32.mrf.mxu2 }
 0x150   :  { %v1156_v7 = vpop.f32.mrf.mxu3  ;;  %v439_v57 = vadd.f32 %v438_v4, %v1140_v44  ;;  %v536_v21 = vmul.f32 0.125, %v532_v20 }
 0x151   :  { %v468_v41 = vadd.f32 %v1156_v7, %v1140_v44 }
 0x152   :  { %v490_v30 = vmax.f32 %v439_v57, 0.0  ;;  %v615_v57 = vld [vmem:[%s1226_s7 + $0x10] sm:$0xff]  ;;  %s828_s7 = smov [#allocation3]  }
 0x153   :  { %v491_v16 = vmax.f32 %v468_v41, 0.0  ;;  %s737_s19 = sshll.u32 %s828_s7, 4  ;;  %s738_s19 = int_to_ptr.vmem [resolvable:$true] %s737_s19 }
 0x154   :  { %v529_v58 = vadd.f32 %v525_v10, %v490_v30  ;;  %v693_v30 = vpop.permute.xlu2 %692 }
 0x157   :  { %v441_v25 = vpop.f32.mrf.mxu2 }
 0x158   :  { %v470_v22 = vpop.f32.mrf.mxu3  ;;  %v442_v49 = vadd.f32 %v441_v25, %v1138_v43  ;;  %v543_v25 = vld [vmem:[%s1224_s5 + $0x18] sm:$0xff] }
 0x159   :  { %v471_v8 = vadd.f32 %v470_v22, %v1138_v43  ;;  %v561_v22 = vpop.permute.xlu1 %560 }
 0x15a   :  { %v498_v2 = vmax.f32 %v442_v49, 0.0  ;;  %v551_v49 = vpop.permute.xlu0 %550 }
 0x15b   :  { %v499_v43 = vmax.f32 %v471_v8, 0.0 }
 0x15c   :  { %v530_v34 = vadd.f32 %v526_v6, %v498_v2  ;;  %v708_v14 = vpop.permute.xlu2 %707 }
 0x15e   :  { %v534_v60 = vadd.f32 %v530_v34, %v499_v43 }
 0x15f   :  { %v444_v5 = vpop.f32.mrf.mxu2 }
 0x160   :  { %v445_v4 = vadd.f32 %v444_v5, %v1130_v37  ;;  %v473_v9 = vpop.f32.mrf.mxu3  ;;  %v538_v44 = vmul.f32 0.125, %v534_v60 }
 0x161   :  { %v474_v11 = vadd.f32 %v473_v9, %v1130_v37  ;;  %v533_v37 = vadd.f32 %v529_v58, %v491_v16  ;;  %v624_v61 = vpop.permute.xlu1 %623 }
 0x162   :  { %v506_v12 = vmax.f32 %v445_v4, 0.0  ;;  %v634_v1 = vpop.permute.xlu0 %633 }
 0x163   :  { %v507_v48 = vmax.f32 %v474_v11, 0.0  ;;  %v537_v7 = vmul.f32 0.125, %v533_v37 }
 0x164   :  { %v531_v59 = vadd.f32 %v527_v13, %v506_v12 }
 0x166   :  { %v535_v17 = vadd.f32 %v531_v59, %v507_v48 }
 0x168   :  { %v539_v19 = vmul.f32 0.125, %v535_v17 }
 0x169   :  { %v639_v2 = vpop.permute.xlu1 %638 }
 0x16a   :  { %592 = vmatpush.msra.mxu0 %v539_v19  ;;  %v698_v9 = vpop.permute.xlu0 %697 }
 0x16c   :  { %593 = vmatpush.msra.mxu0 %v538_v44 }
 0x16e   :  { %594 = vmatpush.msra.mxu0 %v537_v7 }
 0x170   :  { %595 = vmatpush.msra.mxu0 %v536_v21 }
 0x171   :  { %780 = vmatmul.msk.f32.vlgmr.msra.gmra.mxu0 %vm231_vm0, %v540_v42  ;;  %v703_v33 = vpop.permute.xlu1 %702 }
 0x172   :  { %v727_v60 = vpop.permute.xlu0 %726 }
 0x173   :  { %v729_v18 = vperm.slane %v727_v60, 0 }
 0x179   :  { %781 = vmatmul.msk.f32.gmra.mxu0 %vm231_vm0, %v541_v51 }
 0x181   :  { %782 = vmatmul.msk.f32.gmra.mxu0 %vm231_vm0, %v542_v23 }
 0x189   :  { %783 = vmatmul.msk.f32.gmra.mxu0 %vm231_vm0, %v543_v25 }
 0x1ee   :  { %v597_v26 = vpop.f32.mrf.mxu0 }
 0x1ef   :  { %v598_v31 = vadd.f32 %v597_v26, %v551_v49 }
 0x1f1   :  { %v609_v53 = vmax.f32 %v598_v31, 0.0 }
 0x1f6   :  { %v600_v27 = vpop.f32.mrf.mxu0 }
 0x1f7   :  { %v601_v46 = vadd.f32 %v600_v27, %v556_v45 }
 0x1f9   :  { %v610_v52 = vmax.f32 %v601_v46, 0.0 }
 0x1fe   :  { %v603_v28 = vpop.f32.mrf.mxu0 }
 0x1ff   :  { %v604_v35 = vadd.f32 %v603_v28, %v561_v22 }
 0x201   :  { %v611_v50 = vmax.f32 %v604_v35, 0.0 }
 0x206   :  { %v606_v24 = vpop.f32.mrf.mxu0 }
 0x207   :  { %v607_v36 = vadd.f32 %v606_v24, %v566_v32 }
 0x209   :  { %v612_v47 = vmax.f32 %v607_v36, 0.0 }
 0x20b   :  { %665 = vmatpush.msra.mxu1 %v612_v47 }
 0x20d   :  { %666 = vmatpush.msra.mxu1 %v611_v50 }
 0x20f   :  { %667 = vmatpush.msra.mxu1 %v610_v52 }
 0x211   :  { %668 = vmatpush.msra.mxu1 %v609_v53 }
 0x212   :  { %784 = vmatmul.msk.f32.vlgmr.msra.gmra.mxu1 %vm231_vm0, %v613_v55 }
 0x21a   :  { %785 = vmatmul.msk.f32.gmra.mxu1 %vm231_vm0, %v614_v56 }
 0x222   :  { %786 = vmatmul.msk.f32.gmra.mxu1 %vm231_vm0, %v615_v57 }
 0x22a   :  { %787 = vmatmul.msk.f32.gmra.mxu1 %vm231_vm0, %v616_v29 }
 0x28f   :  { %v670_v54 = vpop.f32.mrf.mxu1 }
 0x290   :  { %v671_v38 = vadd.f32 %v670_v54, %v624_v61 }
 0x292   :  { %v682_v8 = vmax.f32 %v671_v38, 0.0 }
 0x294   :  { %v710_v11 = vmul.f32 %v693_v30, %v682_v8 }
 0x297   :  { %v673_v63 = vpop.f32.mrf.mxu1 }
 0x298   :  { %v674_v3 = vadd.f32 %v673_v63, %v629_v62 }
 0x29a   :  { %v683_v6 = vmax.f32 %v674_v3, 0.0 }
 0x29c   :  { %v711_v40 = vmul.f32 %v698_v9, %v683_v6 }
 0x29e   :  { %v714_v12 = vadd.f32 %v711_v40, %v710_v11 }
 0x29f   :  { %v676_v39 = vpop.f32.mrf.mxu1 }
 0x2a0   :  { %v677_v5 = vadd.f32 %v676_v39, %v634_v1 }
 0x2a2   :  { %v684_v4 = vmax.f32 %v677_v5, 0.0 }
 0x2a4   :  { %v712_v41 = vmul.f32 %v703_v33, %v684_v4 }
 0x2a6   :  { %v715_v15 = vadd.f32 %v714_v12, %v712_v41 }
 0x2a7   :  { %v679_v10 = vpop.f32.mrf.mxu1 }
 0x2a8   :  { %v680_v34 = vadd.f32 %v679_v10, %v639_v2 }
 0x2aa   :  { %v685_v13 = vmax.f32 %v680_v34, 0.0 }
 0x2ac   :  { %v713_v58 = vmul.f32 %v708_v14, %v685_v13 }
 0x2ae   :  { %v716_v43 = vadd.f32 %v715_v15, %v713_v58 }
 0x2b0   :  { %v717_v59 = vrot.slane %v716_v43, 4 }
 0x2b2   :  { %v718_v48 = vadd.f32 %v717_v59, %v716_v43 }
 0x2b4   :  { %v719_v0 = vrot.slane %v718_v48, 2 }
 0x2b6   :  { %v720_v16 = vadd.f32 %v719_v0, %v718_v48 }
 0x2b8   :  { %v721_v17 = vrot.slane %v720_v16, 1 }
 0x2ba   :  { %v722_v37 = vadd.f32 %v721_v17, %v720_v16 }
 0x2bc   :  { %v730_v19 = vadd.f32 %v729_v18, %v722_v37 }
 0x2be   :  { %731 = vst [vmem:[#allocation3] sm:$0x1] %v730_v19 }
 0x2bf   :  { %742 = dma.vmem_to_hbm [thread:$0]  %s738_s19, 16, %s740_s8, [#allocation4]  }
 0x2c0   :  { %825 = dma.done.wait [#allocation4], 16  }
 0x2c1   :  { %826 = vsyncadd [#allocation4], 4294967280 }
 0x2c2   :  { %747 = vsyncpa [#allocation4], 1 }

</bundles_post_ra>
